<compile_context>
chip_gen: v7x
topology: tpu7x:2x2x1
jax: 0.10.0
libtpu: 0.0.40
codegen_flags: <defaults>
</compile_context>

<pallas_src>
import functools

import jax
import jax.numpy as jnp
from jax.experimental import pallas as pl
from jax.experimental.pallas import tpu as pltpu

_LANE = 128


def _round_up(x, m):
    return (x + m - 1) // m * m


# ---------------------------------------------------------------------------
# Fused MLP kernel: x @ W1 + b1 -> ReLU -> [Dropout = id] -> ... -> x @ WL + bL
# ---------------------------------------------------------------------------
def _mlp_kernel(*refs, num_layers, use_hidden_scratch):
    x_ref = refs[0]
    w_refs = refs[1:1 + num_layers]
    b_refs = refs[1 + num_layers:1 + 2 * num_layers]
    if use_hidden_scratch:
        o_ref, hid_ref = refs[-2], refs[-1]
    else:
        o_ref, hid_ref = refs[-1], None

    h = x_ref[...]
    for i in range(num_layers):
        w = w_refs[i][...]
        if h.dtype != w.dtype:
            # Only hit on the bf16 path (f32 accumulator -> bf16 MXU input) or
            # if x's dtype differs from the params; the f32 path has no casts.
            h = h.astype(w.dtype)
        h = jnp.dot(h, w, preferred_element_type=jnp.float32)
        h = h + b_refs[i][...].astype(jnp.float32)
        if i < num_layers - 1:
            h = jnp.maximum(h, 0.0)  # ReLU
            # TODO(synk): training-mode dropout would need pltpu.prng_seed /
            # pltpu.prng_random_bits; inference (eval) semantics only here.
            if hid_ref is not None:
                # Give the large intermediate a deterministic VMEM home to
                # reduce vreg pressure around the next matmul.
                hid_ref[...] = h
                h = hid_ref[...]
    o_ref[...] = h.astype(o_ref.dtype)


# ---------------------------------------------------------------------------
# Parameter padding: make every layer's output lane-dense (multiple of 128).
# Zero-padded columns + zero bias produce exactly 0 (ReLU(0) = 0), and the
# matching zero-padded rows of the next layer contribute nothing, so the
# result is bit-identical to the unpadded computation.
# ---------------------------------------------------------------------------
def _pad_params(weights, biases, dtype):
    padded_w, padded_b, col_dims = [], [], []
    prev_cols = weights[0].shape[0]  # first layer's input rows stay unpadded
    for w, b in zip(weights, biases):
        k, n = w.shape
        n_p = _round_up(n, _LANE)
        wp = jnp.pad(w.astype(dtype), ((0, prev_cols - k), (0, n_p - n)))
        bp = jnp.pad(b.reshape(1, -1).astype(dtype), ((0, 0), (0, n_p - n)))
        padded_w.append(wp)
        padded_b.append(bp)
        col_dims.append(n_p)
        prev_cols = n_p
    return padded_w, padded_b, col_dims


# ---------------------------------------------------------------------------
# Wrapper
# ---------------------------------------------------------------------------
def attribute_decoder(x, params, *, block_rows=512, use_bf16_matmul=False):
    """Fused forward pass of AttributeDecoder (inference / eval mode)."""
    param_dtype = jnp.bfloat16 if use_bf16_matmul else jnp.float32
    ws, bs, col_dims = _pad_params(params["weights"], params["biases"],
                                   param_dtype)
    num_layers = len(ws)
    out_dim = params["weights"][-1].shape[1]
    out_p = col_dims[-1]
    m, in_dim = x.shape

    # Row tiling: full batch for tiny m; otherwise 128-aligned tiles chosen so
    # the grid has >= 2 (ideally even) steps for megacore sharding on v7x.
    if m <= _LANE:
        tm = m
    else:
        tm = min(block_rows, _round_up(pl.cdiv(m, 2), _LANE))
    grid = (pl.cdiv(m, tm),)

    x_spec = pl.BlockSpec((tm, in_dim), lambda i: (i, 0))
    o_spec = pl.BlockSpec((tm, out_p), lambda i: (i, 0))

    # Explicit VMEM scratch for the hidden activation when it is too large to
    # live comfortably in the 64-vreg file.
    hidden_p = max(col_dims[:-1]) if num_layers > 1 else 0
    use_hidden_scratch = num_layers > 1 and tm * hidden_p * 4 > 128 * 1024
    scratch_shapes = ([pltpu.VMEM((tm, hidden_p), jnp.float32)]
                      if use_hidden_scratch else [])

    # Cost estimate (advisory, lets XLA overlap surrounding ops).
    itemsize = ws[0].dtype.itemsize
    flops = 2 * m * sum(w.shape[0] * w.shape[1] for w in ws)
    bytes_accessed = (x.size * x.dtype.itemsize
                      + sum(w.size for w in ws) * itemsize
                      + sum(b.size for b in bs) * itemsize
                      + m * out_p * 4)
    cost = pl.CostEstimate(flops=int(flops), transcendentals=0,
                           bytes_accessed=int(bytes_accessed))

    # Explicit VMEM budget: resident params (worst case x2 buffers) + double-
    # buffered x/out tiles + hidden scratch + compiler headroom, clamped to
    # ~85% of this chip's physical VMEM.
    resident = (sum(w.size for w in ws) + sum(b.size for b in bs)) * itemsize
    tile_bytes = 2 * tm * in_dim * x.dtype.itemsize + 2 * tm * out_p * 4
    need = 2 * resident + tile_bytes + (tm * hidden_p * 4 if use_hidden_scratch
                                        else 0) + (8 << 20)
    try:
        phys = pltpu.get_tpu_info().vmem_capacity_bytes
    except Exception:
        phys = 64 << 20  # v7x-safe default
    vmem_limit = int(min(int(0.85 * phys), max(32 << 20, need)))

    def _run(single_buffer_weights):
        def const_spec(shape):
            if single_buffer_weights:
                return pl.BlockSpec(shape, lambda i: (0, 0),
                                    pipeline_mode=pl.Buffered(1))
            return pl.BlockSpec(shape, lambda i: (0, 0))

        w_specs = [const_spec(w.shape) for w in ws]
        b_specs = [const_spec(b.shape) for b in bs]
        call = pl.pallas_call(
            functools.partial(_mlp_kernel, num_layers=num_layers,
                              use_hidden_scratch=use_hidden_scratch),
            out_shape=jax.ShapeDtypeStruct((m, out_p), jnp.float32),
            grid_spec=pltpu.PrefetchScalarGridSpec(
                num_scalar_prefetch=0,
                grid=grid,
                in_specs=[x_spec] + w_specs + b_specs,
                out_specs=o_spec,
                scratch_shapes=scratch_shapes),
            compiler_params=pltpu.CompilerParams(
                dimension_semantics=("parallel",),
                vmem_limit_bytes=vmem_limit),
            cost_estimate=cost,
        )
        return call(x, *ws, *bs)

    try:
        out_padded = _run(single_buffer_weights=True)
    except Exception:
        # pipeline_mode=pl.Buffered(1) unsupported on this jax build; fall back
        # to default double-buffered resident weights (correctness identical).
        out_padded = _run(single_buffer_weights=False)

    return out_padded[:, :out_dim]


# ---------------------------------------------------------------------------
# Parameter init mirroring torch.nn.Linear defaults (U(-1/sqrt(fan_in), ...)).
# ---------------------------------------------------------------------------
def init_attribute_decoder_params(key, in_dim, out_dim, num_layers=2,
                                  hidden_dim=None):
    if hidden_dim is None:
        hidden_dim = in_dim
    if num_layers == 1:
        dims = [(in_dim, out_dim)]
    else:
        dims = [(in_dim, hidden_dim)]
        dims += [(hidden_dim, hidden_dim)] * (num_layers - 2)
        dims += [(hidden_dim, out_dim)]

    weights, biases = [], []
    for (din, dout) in dims:
        key, kw, kb = jax.random.split(key, 3)
        lim = 1.0 / (din ** 0.5)
        weights.append(jax.random.uniform(kw, (din, dout), jnp.float32, -lim, lim))
        biases.append(jax.random.uniform(kb, (dout,), jnp.float32, -lim, lim))
    return {"weights": weights, "biases": biases}


# ---------------------------------------------------------------------------
# Demo / self-check
# ---------------------------------------------------------------------------
if __name__ == "__main__":
    key = jax.random.PRNGKey(0)
    batch, in_dim, out_dim = 16, 32, 10

    kx, kp = jax.random.split(key)
    x = jax.random.normal(kx, (batch, in_dim), jnp.float32)
    params = init_attribute_decoder_params(kp, in_dim, out_dim, num_layers=2)

    y = jax.block_until_ready(attribute_decoder(x, params))

    # Pure-JAX reference (Linear -> ReLU -> [Dropout=id] -> Linear).
    h_ref = jnp.maximum(x @ params["weights"][0] + params["biases"][0], 0.0)
    y_ref = h_ref @ params["weights"][1] + params["biases"][1]

    assert y.shape == (batch, out_dim)
    assert jnp.allclose(y, y_ref, atol=1e-5, rtol=1e-5)
    print("KERNEL_OK")
</pallas_src>

<mosaic_0001>
module attributes {stable_mosaic.version = 11 : i64} {
  func.func @_mlp_kernel(%arg0: i32, %arg1: memref<16x32xf32, #tpu.memory_space<vmem>>, %arg2: memref<32x128xf32, #tpu.memory_space<vmem>>, %arg3: memref<128x128xf32, #tpu.memory_space<vmem>>, %arg4: memref<1x128xf32, #tpu.memory_space<vmem>>, %arg5: memref<1x128xf32, #tpu.memory_space<vmem>>, %arg6: memref<16x128xf32, #tpu.memory_space<vmem>>) attributes {dimension_semantics = [#tpu.dimension_semantics<parallel>], iteration_bounds = array<i64: 1>, scalar_prefetch = 0 : i64, scratch_operands = 0 : i64, tpu.core_type = #tpu.core_type<tc>, window_params = [{transform_indices = @transform_0, window_bounds = array<i64: 16, 32>}, {pipeline_mode = #tpu.pipeline_mode<synchronous>, transform_indices = @transform_1, window_bounds = array<i64: 32, 128>}, {pipeline_mode = #tpu.pipeline_mode<synchronous>, transform_indices = @transform_2, window_bounds = array<i64: 128, 128>}, {pipeline_mode = #tpu.pipeline_mode<synchronous>, transform_indices = @transform_3, window_bounds = array<i64: 1, 128>}, {pipeline_mode = #tpu.pipeline_mode<synchronous>, transform_indices = @transform_4, window_bounds = array<i64: 1, 128>}, {transform_indices = @transform_5, window_bounds = array<i64: 16, 128>}]} {
    %c0 = arith.constant 0 : index
    %c0_0 = arith.constant 0 : index
    %0 = vector.load %arg1[%c0, %c0_0] : memref<16x32xf32, #tpu.memory_space<vmem>>, vector<16x32xf32>
    %c0_1 = arith.constant 0 : index
    %c0_2 = arith.constant 0 : index
    %1 = vector.load %arg2[%c0_1, %c0_2] : memref<32x128xf32, #tpu.memory_space<vmem>>, vector<32x128xf32>
    %cst = arith.constant dense<0.000000e+00> : vector<16x128xf32>
    %2 = tpu.matmul %0, %1, %cst {dimension_numbers = #tpu.dot_dimension_numbers<[1], [0], [0], [1], [0, 0, 1, 1], [], []>} : vector<16x32xf32>, vector<32x128xf32>, vector<16x128xf32> -> vector<16x128xf32>
    %c0_3 = arith.constant 0 : index
    %c0_4 = arith.constant 0 : index
    %3 = vector.load %arg4[%c0_3, %c0_4] : memref<1x128xf32, #tpu.memory_space<vmem>>, vector<1x128xf32>
    %4 = vector.broadcast %3 : vector<1x128xf32> to vector<16x128xf32>
    %5 = arith.addf %2, %4 : vector<16x128xf32>
    %cst_5 = arith.constant 0.000000e+00 : f32
    %6 = vector.broadcast %cst_5 : f32 to vector<16x128xf32>
    %7 = arith.maximumf %5, %6 : vector<16x128xf32>
    %c0_6 = arith.constant 0 : index
    %c0_7 = arith.constant 0 : index
    %8 = vector.load %arg3[%c0_6, %c0_7] : memref<128x128xf32, #tpu.memory_space<vmem>>, vector<128x128xf32>
    %cst_8 = arith.constant dense<0.000000e+00> : vector<16x128xf32>
    %9 = tpu.matmul %7, %8, %cst_8 {dimension_numbers = #tpu.dot_dimension_numbers<[1], [0], [0], [1], [0, 0, 1, 1], [], []>} : vector<16x128xf32>, vector<128x128xf32>, vector<16x128xf32> -> vector<16x128xf32>
    %c0_9 = arith.constant 0 : index
    %c0_10 = arith.constant 0 : index
    %10 = vector.load %arg5[%c0_9, %c0_10] : memref<1x128xf32, #tpu.memory_space<vmem>>, vector<1x128xf32>
    %11 = vector.broadcast %10 : vector<1x128xf32> to vector<16x128xf32>
    %12 = arith.addf %9, %11 : vector<16x128xf32>
    %c0_11 = arith.constant 0 : index
    %c0_12 = arith.constant 0 : index
    %13 = vector.load %arg6[%c0_11, %c0_12] : memref<16x128xf32, #tpu.memory_space<vmem>>, vector<16x128xf32>
    tpu.vector_store %arg6[%c0_11, %c0_12], %12 {strides = array<i32>} : memref<16x128xf32, #tpu.memory_space<vmem>>, vector<16x128xf32>,
    return
  }
  func.func @transform_0(%arg0: i32) -> (i32, i32) {
    %c0_i32 = arith.constant 0 : i32
    %c0_i32_0 = arith.constant 0 : i32
    return %arg0, %c0_i32 : i32, i32
  }
  func.func @transform_1(%arg0: i32) -> (i32, i32) {
    %c0_i32 = arith.constant 0 : i32
    %c0_i32_0 = arith.constant 0 : i32
    %c0_i32_1 = arith.constant 0 : i32
    return %c0_i32, %c0_i32_0 : i32, i32
  }
  func.func @transform_2(%arg0: i32) -> (i32, i32) {
    %c0_i32 = arith.constant 0 : i32
    %c0_i32_0 = arith.constant 0 : i32
    %c0_i32_1 = arith.constant 0 : i32
    return %c0_i32, %c0_i32_0 : i32, i32
  }
  func.func @transform_3(%arg0: i32) -> (i32, i32) {
    %c0_i32 = arith.constant 0 : i32
    %c0_i32_0 = arith.constant 0 : i32
    %c0_i32_1 = arith.constant 0 : i32
    return %c0_i32, %c0_i32_0 : i32, i32
  }
  func.func @transform_4(%arg0: i32) -> (i32, i32) {
    %c0_i32 = arith.constant 0 : i32
    %c0_i32_0 = arith.constant 0 : i32
    %c0_i32_1 = arith.constant 0 : i32
    return %c0_i32, %c0_i32_0 : i32, i32
  }
  func.func @transform_5(%arg0: i32) -> (i32, i32) {
    %c0_i32 = arith.constant 0 : i32
    %c0_i32_0 = arith.constant 0 : i32
    return %arg0, %c0_i32 : i32, i32
  }
}

module attributes {stable_mosaic.version = 11 : i64} {
  func.func @_mlp_kernel(%arg0: i32, %arg1: memref<16x32xf32, #tpu.memory_space<vmem>>, %arg2: memref<32x128xf32, #tpu.memory_space<vmem>>, %arg3: memref<128x128xf32, #tpu.memory_space<vmem>>, %arg4: memref<1x128xf32, #tpu.memory_space<vmem>>, %arg5: memref<1x128xf32, #tpu.memory_space<vmem>>, %arg6: memref<16x128xf32, #tpu.memory_space<vmem>>) attributes {dimension_semantics = [#tpu.dimension_semantics<parallel>], iteration_bounds = array<i64: 1>, scalar_prefetch = 0 : i64, scratch_operands = 0 : i64, tpu.core_type = #tpu.core_type<tc>, window_params = [{transform_indices = @transform_0, window_bounds = array<i64: 16, 32>}, {pipeline_mode = #tpu.pipeline_mode<synchronous>, transform_indices = @transform_1, window_bounds = array<i64: 32, 128>}, {pipeline_mode = #tpu.pipeline_mode<synchronous>, transform_indices = @transform_2, window_bounds = array<i64: 128, 128>}, {pipeline_mode = #tpu.pipeline_mode<synchronous>, transform_indices = @transform_3, window_bounds = array<i64: 1, 128>}, {pipeline_mode = #tpu.pipeline_mode<synchronous>, transform_indices = @transform_4, window_bounds = array<i64: 1, 128>}, {transform_indices = @transform_5, window_bounds = array<i64: 16, 128>}]} {
    %c0 = arith.constant 0 : index
    %c0_0 = arith.constant 0 : index
    %0 = vector.load %arg1[%c0, %c0_0] : memref<16x32xf32, #tpu.memory_space<vmem>>, vector<16x32xf32>
    %c0_1 = arith.constant 0 : index
    %c0_2 = arith.constant 0 : index
    %1 = vector.load %arg2[%c0_1, %c0_2] : memref<32x128xf32, #tpu.memory_space<vmem>>, vector<32x128xf32>
    %cst = arith.constant dense<0.000000e+00> : vector<16x128xf32>
    %2 = tpu.matmul %0, %1, %cst {dimension_numbers = #tpu.dot_dimension_numbers<[1], [0], [0], [1], [0, 0, 1, 1], [], []>} : vector<16x32xf32>, vector<32x128xf32>, vector<16x128xf32> -> vector<16x128xf32>
    %c0_3 = arith.constant 0 : index
    %c0_4 = arith.constant 0 : index
    %3 = vector.load %arg4[%c0_3, %c0_4] : memref<1x128xf32, #tpu.memory_space<vmem>>, vector<1x128xf32>
    %4 = vector.broadcast %3 : vector<1x128xf32> to vector<16x128xf32>
    %5 = arith.addf %2, %4 : vector<16x128xf32>
    %cst_5 = arith.constant 0.000000e+00 : f32
    %6 = vector.broadcast %cst_5 : f32 to vector<16x128xf32>
    %7 = arith.maximumf %5, %6 : vector<16x128xf32>
    %c0_6 = arith.constant 0 : index
    %c0_7 = arith.constant 0 : index
    %8 = vector.load %arg3[%c0_6, %c0_7] : memref<128x128xf32, #tpu.memory_space<vmem>>, vector<128x128xf32>
    %cst_8 = arith.constant dense<0.000000e+00> : vector<16x128xf32>
    %9 = tpu.matmul %7, %8, %cst_8 {dimension_numbers = #tpu.dot_dimension_numbers<[1], [0], [0], [1], [0, 0, 1, 1], [], []>} : vector<16x128xf32>, vector<128x128xf32>, vector<16x128xf32> -> vector<16x128xf32>
    %c0_9 = arith.constant 0 : index
    %c0_10 = arith.constant 0 : index
    %10 = vector.load %arg5[%c0_9, %c0_10] : memref<1x128xf32, #tpu.memory_space<vmem>>, vector<1x128xf32>
    %11 = vector.broadcast %10 : vector<1x128xf32> to vector<16x128xf32>
    %12 = arith.addf %9, %11 : vector<16x128xf32>
    %c0_11 = arith.constant 0 : index
    %c0_12 = arith.constant 0 : index
    %13 = vector.load %arg6[%c0_11, %c0_12] : memref<16x128xf32, #tpu.memory_space<vmem>>, vector<16x128xf32>
    tpu.vector_store %arg6[%c0_11, %c0_12], %12 {strides = array<i32>} : memref<16x128xf32, #tpu.memory_space<vmem>>, vector<16x128xf32>,
    return
  }
  func.func @transform_0(%arg0: i32) -> (i32, i32) {
    %c0_i32 = arith.constant 0 : i32
    %c0_i32_0 = arith.constant 0 : i32
    return %arg0, %c0_i32 : i32, i32
  }
  func.func @transform_1(%arg0: i32) -> (i32, i32) {
    %c0_i32 = arith.constant 0 : i32
    %c0_i32_0 = arith.constant 0 : i32
    %c0_i32_1 = arith.constant 0 : i32
    return %c0_i32, %c0_i32_0 : i32, i32
  }
  func.func @transform_2(%arg0: i32) -> (i32, i32) {
    %c0_i32 = arith.constant 0 : i32
    %c0_i32_0 = arith.constant 0 : i32
    %c0_i32_1 = arith.constant 0 : i32
    return %c0_i32, %c0_i32_0 : i32, i32
  }
  func.func @transform_3(%arg0: i32) -> (i32, i32) {
    %c0_i32 = arith.constant 0 : i32
    %c0_i32_0 = arith.constant 0 : i32
    %c0_i32_1 = arith.constant 0 : i32
    return %c0_i32, %c0_i32_0 : i32, i32
  }
  func.func @transform_4(%arg0: i32) -> (i32, i32) {
    %c0_i32 = arith.constant 0 : i32
    %c0_i32_0 = arith.constant 0 : i32
    %c0_i32_1 = arith.constant 0 : i32
    return %c0_i32, %c0_i32_0 : i32, i32
  }
  func.func @transform_5(%arg0: i32) -> (i32, i32) {
    %c0_i32 = arith.constant 0 : i32
    %c0_i32_0 = arith.constant 0 : i32
    return %arg0, %c0_i32 : i32, i32
  }
}

</mosaic_0001>

<bundles_post_ra>
// kernel: tpu_custom_call.1
= control target key start
LH: loop header
LB: loop body
LE: loop exit
PB: predicated region body
PF: predicated region fallthrough
CT: control target
= control target key end

     0   :  { %10 = vsyncpa [#allocation3], 0  ;;  %s602_s0 = inlined_call_operand.hbm [shape: f32[16,32], index: 0, kind: input, shape index: {}]   ;;  %s603_s1 = inlined_call_operand.hbm [shape: f32[32,128], index: 1, kind: input, shape index: {}]   ;;  %s604_s2 = inlined_call_operand.hbm [shape: f32[128,128], index: 2, kind: input, shape index: {}]   ;;  %s605_s3 = inlined_call_operand.vmem [shape: f32[1,128], index: 3, kind: input, shape index: {}]   ;;  %s606_s4 = inlined_call_operand.vmem [shape: f32[1,128], index: 4, kind: input, shape index: {}]   ;;  %s607_s5 = inlined_call_operand.hbm [shape: f32[16,128], index: 5, kind: output, shape index: {}]  }
   0x1   :  { %11 = vsyncpa [#allocation6], 0 }
   0x2   :  { %12 = vsyncpa [#allocation4], 0  ;;  %s491_s18 = smov [#allocation5]   ;;  %s492_s20 = smov [#allocation2]  }
   0x3   :  { %s30_s19 = sshll.u32 %s491_s18, 4  ;;  %s18_s21 = sshll.u32 %s492_s20, 4  ;;  %s31_s19 = int_to_ptr.vmem [resolvable:$true] %s30_s19  ;;  %s527_s21 = int_to_ptr.vmem [resolvable:$true] %s18_s21 }
   0x4   :  { %s397_s24 = scalar_lea.hbm %s603_s1, 512 }
   0x5   :  { %p398_p0 = scmp.ne.s32.totalorder %s603_s1, %s397_s24  ;;  %p401_p1 = scmp.lt.u32.totalorder %s397_s24, %s603_s1 }
   0x7   :  { %p403_p2 = pnand %p401_p1, %p398_p0 }
   0x9   :  { %406 = shalt.err (!%p403_p2)
}
   0xa   :  { %s407_s29 = scalar_lea.vmem %s31_s19, 512  ;;  %p412_p4 = scmp.lt.s32.totalorder %s31_s19, %s31_s19 }
   0xb   :  { %p408_p3 = scmp.ne.s32.totalorder %s31_s19, %s407_s29  ;;  %p413_p5 = scmp.lt.s32.totalorder %s407_s29, %s407_s29 }
   0xd   :  { %p414_p6 = por %p413_p5, %p412_p4 }
   0xf   :  { %p415_p7 = pnand %p414_p6, %p408_p3 }
  0x11   :  { %418 = shalt.err (!%p415_p7)
}
  0x12   :  { %s493_s30 = smov 128   ;;  %s494_s6 = smov 8  }
  0x13   :  { %36 = dma.hbm_to_vmem [thread:$0]  %s603_s1, 512, %s31_s19, [#allocation6], %s493_s30, %s493_s30, %s494_s6  }
  0x14   :  { %s419_s11 = scalar_lea.hbm %s602_s0, 256 }
  0x15   :  { %p420_p8 = scmp.ne.s32.totalorder %s602_s0, %s419_s11  ;;  %p423_p9 = scmp.lt.u32.totalorder %s419_s11, %s602_s0 }
  0x17   :  { %p425_p10 = pnand %p423_p9, %p420_p8 }
  0x19   :  { %428 = shalt.err (!%p425_p10)
}
  0x1a   :  { %s429_s16 = scalar_lea.vmem %s527_s21, 256  ;;  %p434_p12 = scmp.lt.s32.totalorder %s527_s21, %s527_s21 }
  0x1b   :  { %p430_p11 = scmp.ne.s32.totalorder %s527_s21, %s429_s16  ;;  %p435_p13 = scmp.lt.s32.totalorder %s429_s16, %s429_s16 }
  0x1d   :  { %p436_p0 = por %p435_p13, %p434_p12 }
  0x1f   :  { %p437_p1 = pnand %p436_p0, %p430_p11 }
  0x21   :  { %440 = shalt.err (!%p437_p1)
}
  0x22   :  { %24 = dma.hbm_to_vmem [thread:$0]  %s602_s0, 256, %s527_s21, [#allocation3], %s493_s30, %s493_s30, %s494_s6  }
  0x23   :  { %s495_s18 = smov [#allocation7]   ;;  %s441_s23 = scalar_lea.hbm %s604_s2, 2048 }
  0x24   :  { %s42_s19 = sshll.u32 %s495_s18, 4  ;;  %p442_p2 = scmp.ne.s32.totalorder %s604_s2, %s441_s23  ;;  %s43_s19 = int_to_ptr.vmem [resolvable:$true] %s42_s19 }
  0x25   :  { %p445_p3 = scmp.lt.u32.totalorder %s441_s23, %s604_s2 }
  0x27   :  { %p447_p4 = pnand %p445_p3, %p442_p2 }
  0x29   :  { %450 = shalt.err (!%p447_p4)
}
  0x2a   :  { %s451_s28 = scalar_lea.vmem %s43_s19, 2048  ;;  %p456_p6 = scmp.lt.s32.totalorder %s43_s19, %s43_s19 }
  0x2b   :  { %p452_p5 = scmp.ne.s32.totalorder %s43_s19, %s451_s28  ;;  %p457_p7 = scmp.lt.s32.totalorder %s451_s28, %s451_s28 }
  0x2d   :  { %p458_p8 = por %p457_p7, %p456_p6 }
  0x2f   :  { %p459_p9 = pnand %p458_p8, %p452_p5 }
  0x31   :  { %462 = shalt.err (!%p459_p9)
}
  0x32   :  { %48 = dma.hbm_to_vmem [thread:$0]  %s604_s2, 2048, %s43_s19, [#allocation6], %s493_s30, %s493_s30, %s494_s6  }
  0x33   :  { %485 = dma.done.wait [#allocation3], 256  }
  0x34   :  { %486 = vsyncadd [#allocation3], 4294967040 }
  0x35   :  { %487 = dma.done.wait [#allocation6], 2560  }
  0x36   :  { %488 = vsyncadd [#allocation6], 4294964736  ;;  %vm75_vm0 = vcmask 261120   ;;  %v64_v0 = vld [vmem:[#allocation5] sm:$0xff]  ;;  %v65_v1 = vld [vmem:[#allocation5 + $0x8] sm:$0xff]  ;;  %s496_s9 = smov [#allocation8]  }
  0x37   :  { %v66_v2 = vld [vmem:[#allocation5 + $0x10] sm:$0xff]  ;;  %v351_v3 = vpack.c.bf16 %v65_v1, %v64_v0  ;;  %v67_v4 = vld [vmem:[#allocation5 + $0x18] sm:$0xff]  ;;  %v159_v7 = vld [vmem:[#allocation7] sm:$0xff]  ;;  %s264_s10 = sshll.u32 %s496_s9, 4  ;;  %s265_s10 = int_to_ptr.vmem [resolvable:$true] %s264_s10 }
  0x38   :  { %v62_v5 = vld [vmem:[#allocation2] sm:$0xff]  ;;  %v355_v6 = vpack.c.bf16 %v67_v4, %v66_v2  ;;  %v160_v8 = vld [vmem:[#allocation7 + $0x8] sm:$0xff]  ;;  %v162_v11 = vld [vmem:[#allocation7 + $0x18] sm:$0xff]  ;;  %p468_p11 = scmp.lt.s32.totalorder %s265_s10, %s265_s10 }
  0x39   :  { %313 = vmatprep.mubr.msk.f32.mxu0 %vm75_vm0, %v62_v5  ;;  %v161_v9 = vld [vmem:[#allocation7 + $0x10] sm:$0xff]  ;;  %352 = vmatprep.subr.bf16.mxu0 %v351_v3  ;;  %v359_v10 = vpack.c.bf16 %v160_v8, %v159_v7  ;;  %v163_v13 = vld [vmem:[#allocation7 + $0x20] sm:$0xff]  ;;  %v164_v14 = vld [vmem:[#allocation7 + $0x28] sm:$0xff] }
  0x3a   :  { %354 = vmatpush3.bf16.msra.mxu0 %v351_v3  ;;  %v363_v12 = vpack.c.bf16 %v162_v11, %v161_v9  ;;  %v367_v15 = vpack.c.bf16 %v164_v14, %v163_v13  ;;  %v63_v16 = vld [vmem:[#allocation2 + $0x8] sm:$0xff]  ;;  %v165_v17 = vld [vmem:[#allocation7 + $0x30] sm:$0xff]  ;;  %v167_v20 = vld [vmem:[#allocation7 + $0x40] sm:$0xff] }
  0x3b   :  { %356 = vmatprep.subr.bf16.mxu0 %v355_v6  ;;  %360 = vmatprep.subr.bf16.mxu1 %v359_v10  ;;  %v166_v18 = vld [vmem:[#allocation7 + $0x38] sm:$0xff]  ;;  %v168_v21 = vld [vmem:[#allocation7 + $0x48] sm:$0xff]  ;;  %v169_v23 = vld [vmem:[#allocation7 + $0x50] sm:$0xff] }
  0x3c   :  { %362 = vmatpush3.bf16.msra.mxu1 %v359_v10  ;;  %v371_v19 = vpack.c.bf16 %v166_v18, %v165_v17  ;;  %v375_v22 = vpack.c.bf16 %v168_v21, %v167_v20  ;;  %v170_v24 = vld [vmem:[#allocation7 + $0x58] sm:$0xff]  ;;  %v171_v26 = vld [vmem:[#allocation7 + $0x60] sm:$0xff]  ;;  %v172_v27 = vld [vmem:[#allocation7 + $0x68] sm:$0xff] }
  0x3d   :  { %364 = vmatprep.subr.bf16.mxu1 %v363_v12  ;;  %v379_v25 = vpack.c.bf16 %v170_v24, %v169_v23  ;;  %v383_v28 = vpack.c.bf16 %v172_v27, %v171_v26  ;;  %v173_v29 = vld [vmem:[#allocation7 + $0x70] sm:$0xff]  ;;  %v174_v30 = vld [vmem:[#allocation7 + $0x78] sm:$0xff] }
  0x3e   :  { %358 = vmatpush3.bf16.msra.mxu0 %v355_v6  ;;  %v387_v31 = vpack.c.bf16 %v174_v30, %v173_v29  ;;  %v277_v32 = vld [vmem:[%s605_s3] ss:$0 sm:$0xff]  ;;  %s463_s3 = scalar_lea.vmem %s265_s10, 256 }
  0x3f   :  { %v280_v39 = vld [vmem:[%s606_s4] ss:$0 sm:$0xff]  ;;  %p464_p10 = scmp.ne.s32.totalorder %s265_s10, %s463_s3  ;;  %p469_p12 = scmp.lt.s32.totalorder %s463_s3, %s463_s3 }
  0x40   :  { %366 = vmatpush3.bf16.msra.mxu1 %v363_v12 }
  0x41   :  { %314 = vmatmul.mubr.msk.f32.vlgmr.msra.gmra.mrb[0].mxu0 %vm75_vm0, %v63_v16  ;;  %368 = vmatprep.subr.bf16.mxu1 %v367_v15  ;;  %p470_p13 = por %p469_p12, %p468_p11 }
  0x43   :  { %p471_p0 = pnand %p470_p13, %p464_p10 }
  0x44   :  { %370 = vmatpush3.bf16.msra.mxu1 %v367_v15 }
  0x45   :  { %372 = vmatprep.subr.bf16.mxu1 %v371_v19 }
  0x48   :  { %374 = vmatpush3.bf16.msra.mxu1 %v371_v19 }
  0x49   :  { %376 = vmatprep.subr.bf16.mxu1 %v375_v22 }
  0x4c   :  { %378 = vmatpush3.bf16.msra.mxu1 %v375_v22 }
  0x4d   :  { %380 = vmatprep.subr.bf16.mxu1 %v379_v25 }
  0x50   :  { %382 = vmatpush3.bf16.msra.mxu1 %v379_v25 }
  0x51   :  { %384 = vmatprep.subr.bf16.mxu1 %v383_v28 }
  0x54   :  { %386 = vmatpush3.bf16.msra.mxu1 %v383_v28 }
  0x55   :  { %388 = vmatprep.subr.bf16.mxu1 %v387_v31 }
  0x58   :  { %390 = vmatpush3.bf16.msra.mxu1 %v387_v31 }
 0x114   :  { %v315_v33 = vpop.f32.mrb[0].mxu0 }
 0x115   :  { %v154_v34 = vadd.f32 %v315_v33, %v277_v32  ;;  %v148_v35 = vpop.f32.mrb[1].mxu0 }
 0x116   :  { %v149_v36 = vadd.f32 %v277_v32, %v148_v35 }
 0x117   :  { %v158_v38 = vmax.f32 %v154_v34, 0.0 }
 0x118   :  { %v157_v37 = vmax.f32 %v149_v36, 0.0 }
 0x11a   :  { %348 = vmatprep.mubr.f32.mxu1 %v157_v37 }
 0x11b   :  { %349 = vmatmul.mubr.f32.vlgmr.msra.gmra.mrb[0].mxu1 %v158_v38 }
 0x1ee   :  { %v350_v40 = vpop.f32.mrb[0].mxu1 }
 0x1ef   :  { %v254_v41 = vadd.f32 %v350_v40, %v280_v39  ;;  %v248_v42 = vpop.f32.mrb[1].mxu1 }
 0x1f0   :  { %v249_v43 = vadd.f32 %v280_v39, %v248_v42 }
 0x1f1   :  { %258 = vst [vmem:[#allocation8 + $0x8] sm:$0xff] %v254_v41 }
 0x1f2   :  { %257 = vst [vmem:[#allocation8] sm:$0xff] %v249_v43 }
 0x1f3   :  { %474 = shalt.err (!%p471_p0)
}
 0x1f4   :  { %s475_s4 = scalar_lea.hbm %s607_s5, 256 }
 0x1f5   :  { %p476_p1 = scmp.ne.s32.totalorder %s607_s5, %s475_s4  ;;  %p479_p2 = scmp.lt.u32.totalorder %s475_s4, %s607_s5 }
 0x1f7   :  { %p481_p3 = pnand %p479_p2, %p476_p1 }
 0x1f9   :  { %484 = shalt.err (!%p481_p3)
}
 0x1fa   :  { %270 = dma.vmem_to_hbm [thread:$0]  %s265_s10, 256, %s607_s5, [#allocation4], %s493_s30, %s493_s30, %s494_s6  }
 0x1fb   :  { %489 = dma.done.wait [#allocation4], 256  }
 0x1fc   :  { %490 = vsyncadd [#allocation4], 4294967040 }
 0x1fd   :  { %274 = vsyncpa [#allocation3], 1 }
 0x1fe   :  { %275 = vsyncpa [#allocation6], 1 }
 0x1ff   :  { %276 = vsyncpa [#allocation4], 1 }

// kernel: tpu_custom_call.1
= control target key start
LH: loop header
LB: loop body
LE: loop exit
PB: predicated region body
PF: predicated region fallthrough
CT: control target
= control target key end

     0   :  { %10 = vsyncpa [#allocation3], 0  ;;  %s602_s0 = inlined_call_operand.hbm [shape: f32[16,32], index: 0, kind: input, shape index: {}]   ;;  %s603_s1 = inlined_call_operand.hbm [shape: f32[32,128], index: 1, kind: input, shape index: {}]   ;;  %s604_s2 = inlined_call_operand.hbm [shape: f32[128,128], index: 2, kind: input, shape index: {}]   ;;  %s605_s3 = inlined_call_operand.vmem [shape: f32[1,128], index: 3, kind: input, shape index: {}]   ;;  %s606_s4 = inlined_call_operand.vmem [shape: f32[1,128], index: 4, kind: input, shape index: {}]   ;;  %s607_s5 = inlined_call_operand.hbm [shape: f32[16,128], index: 5, kind: output, shape index: {}]  }
   0x1   :  { %11 = vsyncpa [#allocation6], 0 }
   0x2   :  { %12 = vsyncpa [#allocation4], 0  ;;  %s491_s18 = smov [#allocation5]   ;;  %s492_s20 = smov [#allocation2]  }
   0x3   :  { %s30_s19 = sshll.u32 %s491_s18, 4  ;;  %s18_s21 = sshll.u32 %s492_s20, 4  ;;  %s31_s19 = int_to_ptr.vmem [resolvable:$true] %s30_s19  ;;  %s527_s21 = int_to_ptr.vmem [resolvable:$true] %s18_s21 }
   0x4   :  { %s397_s24 = scalar_lea.hbm %s603_s1, 512 }
   0x5   :  { %p398_p0 = scmp.ne.s32.totalorder %s603_s1, %s397_s24  ;;  %p401_p1 = scmp.lt.u32.totalorder %s397_s24, %s603_s1 }
   0x7   :  { %p403_p2 = pnand %p401_p1, %p398_p0 }
   0x9   :  { %406 = shalt.err (!%p403_p2)
}
   0xa   :  { %s407_s29 = scalar_lea.vmem %s31_s19, 512  ;;  %p412_p4 = scmp.lt.s32.totalorder %s31_s19, %s31_s19 }
   0xb   :  { %p408_p3 = scmp.ne.s32.totalorder %s31_s19, %s407_s29  ;;  %p413_p5 = scmp.lt.s32.totalorder %s407_s29, %s407_s29 }
   0xd   :  { %p414_p6 = por %p413_p5, %p412_p4 }
   0xf   :  { %p415_p7 = pnand %p414_p6, %p408_p3 }
  0x11   :  { %418 = shalt.err (!%p415_p7)
}
  0x12   :  { %s493_s30 = smov 128   ;;  %s494_s6 = smov 8  }
  0x13   :  { %36 = dma.hbm_to_vmem [thread:$0]  %s603_s1, 512, %s31_s19, [#allocation6], %s493_s30, %s493_s30, %s494_s6  }
  0x14   :  { %s419_s11 = scalar_lea.hbm %s602_s0, 256 }
  0x15   :  { %p420_p8 = scmp.ne.s32.totalorder %s602_s0, %s419_s11  ;;  %p423_p9 = scmp.lt.u32.totalorder %s419_s11, %s602_s0 }
  0x17   :  { %p425_p10 = pnand %p423_p9, %p420_p8 }
  0x19   :  { %428 = shalt.err (!%p425_p10)
}
  0x1a   :  { %s429_s16 = scalar_lea.vmem %s527_s21, 256  ;;  %p434_p12 = scmp.lt.s32.totalorder %s527_s21, %s527_s21 }
  0x1b   :  { %p430_p11 = scmp.ne.s32.totalorder %s527_s21, %s429_s16  ;;  %p435_p13 = scmp.lt.s32.totalorder %s429_s16, %s429_s16 }
  0x1d   :  { %p436_p0 = por %p435_p13, %p434_p12 }
  0x1f   :  { %p437_p1 = pnand %p436_p0, %p430_p11 }
  0x21   :  { %440 = shalt.err (!%p437_p1)
}
  0x22   :  { %24 = dma.hbm_to_vmem [thread:$0]  %s602_s0, 256, %s527_s21, [#allocation3], %s493_s30, %s493_s30, %s494_s6  }
  0x23   :  { %s495_s18 = smov [#allocation7]   ;;  %s441_s23 = scalar_lea.hbm %s604_s2, 2048 }
  0x24   :  { %s42_s19 = sshll.u32 %s495_s18, 4  ;;  %p442_p2 = scmp.ne.s32.totalorder %s604_s2, %s441_s23  ;;  %s43_s19 = int_to_ptr.vmem [resolvable:$true] %s42_s19 }
  0x25   :  { %p445_p3 = scmp.lt.u32.totalorder %s441_s23, %s604_s2 }
  0x27   :  { %p447_p4 = pnand %p445_p3, %p442_p2 }
  0x29   :  { %450 = shalt.err (!%p447_p4)
}
  0x2a   :  { %s451_s28 = scalar_lea.vmem %s43_s19, 2048  ;;  %p456_p6 = scmp.lt.s32.totalorder %s43_s19, %s43_s19 }
  0x2b   :  { %p452_p5 = scmp.ne.s32.totalorder %s43_s19, %s451_s28  ;;  %p457_p7 = scmp.lt.s32.totalorder %s451_s28, %s451_s28 }
  0x2d   :  { %p458_p8 = por %p457_p7, %p456_p6 }
  0x2f   :  { %p459_p9 = pnand %p458_p8, %p452_p5 }
  0x31   :  { %462 = shalt.err (!%p459_p9)
}
  0x32   :  { %48 = dma.hbm_to_vmem [thread:$0]  %s604_s2, 2048, %s43_s19, [#allocation6], %s493_s30, %s493_s30, %s494_s6  }
  0x33   :  { %485 = dma.done.wait [#allocation3], 256  }
  0x34   :  { %486 = vsyncadd [#allocation3], 4294967040 }
  0x35   :  { %487 = dma.done.wait [#allocation6], 2560  }
  0x36   :  { %488 = vsyncadd [#allocation6], 4294964736  ;;  %vm75_vm0 = vcmask 261120   ;;  %v64_v0 = vld [vmem:[#allocation5] sm:$0xff]  ;;  %v65_v1 = vld [vmem:[#allocation5 + $0x8] sm:$0xff]  ;;  %s496_s9 = smov [#allocation8]  }
  0x37   :  { %v66_v2 = vld [vmem:[#allocation5 + $0x10] sm:$0xff]  ;;  %v351_v3 = vpack.c.bf16 %v65_v1, %v64_v0  ;;  %v67_v4 = vld [vmem:[#allocation5 + $0x18] sm:$0xff]  ;;  %v159_v7 = vld [vmem:[#allocation7] sm:$0xff]  ;;  %s264_s10 = sshll.u32 %s496_s9, 4  ;;  %s265_s10 = int_to_ptr.vmem [resolvable:$true] %s264_s10 }
  0x38   :  { %v62_v5 = vld [vmem:[#allocation2] sm:$0xff]  ;;  %v355_v6 = vpack.c.bf16 %v67_v4, %v66_v2  ;;  %v160_v8 = vld [vmem:[#allocation7 + $0x8] sm:$0xff]  ;;  %v162_v11 = vld [vmem:[#allocation7 + $0x18] sm:$0xff]  ;;  %p468_p11 = scmp.lt.s32.totalorder %s265_s10, %s265_s10 }
  0x39   :  { %313 = vmatprep.mubr.msk.f32.mxu0 %vm75_vm0, %v62_v5  ;;  %v161_v9 = vld [vmem:[#allocation7 + $0x10] sm:$0xff]  ;;  %352 = vmatprep.subr.bf16.mxu0 %v351_v3  ;;  %v359_v10 = vpack.c.bf16 %v160_v8, %v159_v7  ;;  %v163_v13 = vld [vmem:[#allocation7 + $0x20] sm:$0xff]  ;;  %v164_v14 = vld [vmem:[#allocation7 + $0x28] sm:$0xff] }
  0x3a   :  { %354 = vmatpush3.bf16.msra.mxu0 %v351_v3  ;;  %v363_v12 = vpack.c.bf16 %v162_v11, %v161_v9  ;;  %v367_v15 = vpack.c.bf16 %v164_v14, %v163_v13  ;;  %v63_v16 = vld [vmem:[#allocation2 + $0x8] sm:$0xff]  ;;  %v165_v17 = vld [vmem:[#allocation7 + $0x30] sm:$0xff]  ;;  %v167_v20 = vld [vmem:[#allocation7 + $0x40] sm:$0xff] }
  0x3b   :  { %356 = vmatprep.subr.bf16.mxu0 %v355_v6  ;;  %360 = vmatprep.subr.bf16.mxu1 %v359_v10  ;;  %v166_v18 = vld [vmem:[#allocation7 + $0x38] sm:$0xff]  ;;  %v168_v21 = vld [vmem:[#allocation7 + $0x48] sm:$0xff]  ;;  %v169_v23 = vld [vmem:[#allocation7 + $0x50] sm:$0xff] }
  0x3c   :  { %362 = vmatpush3.bf16.msra.mxu1 %v359_v10  ;;  %v371_v19 = vpack.c.bf16 %v166_v18, %v165_v17  ;;  %v375_v22 = vpack.c.bf16 %v168_v21, %v167_v20  ;;  %v170_v24 = vld [vmem:[#allocation7 + $0x58] sm:$0xff]  ;;  %v171_v26 = vld [vmem:[#allocation7 + $0x60] sm:$0xff]  ;;  %v172_v27 = vld [vmem:[#allocation7 + $0x68] sm:$0xff] }
  0x3d   :  { %364 = vmatprep.subr.bf16.mxu1 %v363_v12  ;;  %v379_v25 = vpack.c.bf16 %v170_v24, %v169_v23  ;;  %v383_v28 = vpack.c.bf16 %v172_v27, %v171_v26  ;;  %v173_v29 = vld [vmem:[#allocation7 + $0x70] sm:$0xff]  ;;  %v174_v30 = vld [vmem:[#allocation7 + $0x78] sm:$0xff] }
  0x3e   :  { %358 = vmatpush3.bf16.msra.mxu0 %v355_v6  ;;  %v387_v31 = vpack.c.bf16 %v174_v30, %v173_v29  ;;  %v277_v32 = vld [vmem:[%s605_s3] ss:$0 sm:$0xff]  ;;  %s463_s3 = scalar_lea.vmem %s265_s10, 256 }
  0x3f   :  { %v280_v39 = vld [vmem:[%s606_s4] ss:$0 sm:$0xff]  ;;  %p464_p10 = scmp.ne.s32.totalorder %s265_s10, %s463_s3  ;;  %p469_p12 = scmp.lt.s32.totalorder %s463_s3, %s463_s3 }
  0x40   :  { %366 = vmatpush3.bf16.msra.mxu1 %v363_v12 }
  0x41   :  { %314 = vmatmul.mubr.msk.f32.vlgmr.msra.gmra.mrb[0].mxu0 %vm75_vm0, %v63_v16  ;;  %368 = vmatprep.subr.bf16.mxu1 %v367_v15  ;;  %p470_p13 = por %p469_p12, %p468_p11 }
  0x43   :  { %p471_p0 = pnand %p470_p13, %p464_p10 }
  0x44   :  { %370 = vmatpush3.bf16.msra.mxu1 %v367_v15 }
  0x45   :  { %372 = vmatprep.subr.bf16.mxu1 %v371_v19 }
  0x48   :  { %374 = vmatpush3.bf16.msra.mxu1 %v371_v19 }
  0x49   :  { %376 = vmatprep.subr.bf16.mxu1 %v375_v22 }
  0x4c   :  { %378 = vmatpush3.bf16.msra.mxu1 %v375_v22 }
  0x4d   :  { %380 = vmatprep.subr.bf16.mxu1 %v379_v25 }
  0x50   :  { %382 = vmatpush3.bf16.msra.mxu1 %v379_v25 }
  0x51   :  { %384 = vmatprep.subr.bf16.mxu1 %v383_v28 }
  0x54   :  { %386 = vmatpush3.bf16.msra.mxu1 %v383_v28 }
  0x55   :  { %388 = vmatprep.subr.bf16.mxu1 %v387_v31 }
  0x58   :  { %390 = vmatpush3.bf16.msra.mxu1 %v387_v31 }
 0x114   :  { %v315_v33 = vpop.f32.mrb[0].mxu0 }
 0x115   :  { %v154_v34 = vadd.f32 %v315_v33, %v277_v32  ;;  %v148_v35 = vpop.f32.mrb[1].mxu0 }
 0x116   :  { %v149_v36 = vadd.f32 %v277_v32, %v148_v35 }
 0x117   :  { %v158_v38 = vmax.f32 %v154_v34, 0.0 }
 0x118   :  { %v157_v37 = vmax.f32 %v149_v36, 0.0 }
 0x11a   :  { %348 = vmatprep.mubr.f32.mxu1 %v157_v37 }
 0x11b   :  { %349 = vmatmul.mubr.f32.vlgmr.msra.gmra.mrb[0].mxu1 %v158_v38 }
 0x1ee   :  { %v350_v40 = vpop.f32.mrb[0].mxu1 }
 0x1ef   :  { %v254_v41 = vadd.f32 %v350_v40, %v280_v39  ;;  %v248_v42 = vpop.f32.mrb[1].mxu1 }
 0x1f0   :  { %v249_v43 = vadd.f32 %v280_v39, %v248_v42 }
 0x1f1   :  { %258 = vst [vmem:[#allocation8 + $0x8] sm:$0xff] %v254_v41 }
 0x1f2   :  { %257 = vst [vmem:[#allocation8] sm:$0xff] %v249_v43 }
 0x1f3   :  { %474 = shalt.err (!%p471_p0)
}
 0x1f4   :  { %s475_s4 = scalar_lea.hbm %s607_s5, 256 }
 0x1f5   :  { %p476_p1 = scmp.ne.s32.totalorder %s607_s5, %s475_s4  ;;  %p479_p2 = scmp.lt.u32.totalorder %s475_s4, %s607_s5 }
 0x1f7   :  { %p481_p3 = pnand %p479_p2, %p476_p1 }
 0x1f9   :  { %484 = shalt.err (!%p481_p3)
}
 0x1fa   :  { %270 = dma.vmem_to_hbm [thread:$0]  %s265_s10, 256, %s607_s5, [#allocation4], %s493_s30, %s493_s30, %s494_s6  }
 0x1fb   :  { %489 = dma.done.wait [#allocation4], 256  }
 0x1fc   :  { %490 = vsyncadd [#allocation4], 4294967040 }
 0x1fd   :  { %274 = vsyncpa [#allocation3], 1 }
 0x1fe   :  { %275 = vsyncpa [#allocation6], 1 }
 0x1ff   :  { %276 = vsyncpa [#allocation4], 1 }

</bundles_post_ra>
